<compile_context>
chip_gen: v7x
topology: tpu7x:2x2x1
jax: 0.10.0
libtpu: 0.0.40
codegen_flags: <defaults>
</compile_context>

<pallas_src>
import jax
import jax.numpy as jnp
from jax.experimental import pallas as pl
from jax.experimental.pallas import tpu as pltpu

_FEAT_PAD = 128  # lane-dense padded hidden width


def _round_up(v, m):
    return ((v + m - 1) // m) * m


# ------------------------- layer-dimension bookkeeping ---------------------- #

def build_layer_dims(config):
    """Reproduce MLPStateless.__init__ layer dimension logic."""
    model_config = config['model']['config']
    if config['use_vision']:
        d = 3 if (config['use_hard_3D_unprojection'] or
                  config['use_soft_3D_unprojection']) else 2
        non_vision_start = model_config['num_ref_descriptors'] * d
    else:
        non_vision_start = 0

    dims = []
    units = model_config['units_per_layer']
    for i, _ in enumerate(units):
        if i == 0:
            input_dim = model_config['num_inputs'] + non_vision_start
        else:
            input_dim = units[i - 1]
            if model_config['use_xyz_passthrough_every_layer']:
                input_dim += 3
        if i == len(units) - 1:
            output_dim = model_config['num_outputs']
        else:
            output_dim = units[i]
        dims.append((input_dim, output_dim))
    return dims, non_vision_start


# --------------------------- parameter preparation -------------------------- #

def prepare_fused_params(params, input_mean, input_std, config,
                         normalize_input=True, compute_dtype=jnp.bfloat16):
    """Fold normalization into layer 0; pack padded, stacked bf16 weights."""
    model_config = config['model']['config']
    use_xyz = model_config['use_xyz_passthrough_every_layer']
    layer_dims, nvs = build_layer_dims(config)
    norm_start = nvs  # normalization_index_start
    eps = 0.001
    L = len(params)
    FP = _FEAT_PAD

    din0, dout0 = layer_dims[0]
    w0 = jnp.asarray(params[0][0], jnp.float32)   # (din0, dout0)
    b0 = jnp.asarray(params[0][1], jnp.float32)   # (dout0,)

    if normalize_input:
        mean = jnp.asarray(input_mean, jnp.float32)
        if config['divide_by_std']:
            inv = 1.0 / (jnp.asarray(input_std, jnp.float32) + eps)
        else:
            inv = jnp.ones_like(mean)
        w_tail = w0[norm_start:, :]
        w0_folded = jnp.concatenate(
            [w0[:norm_start, :], w_tail * inv[:, None]], axis=0)
        b0_folded = b0 - (mean * inv) @ w_tail
    else:
        w0_folded, b0_folded = w0, b0

    din_raw = din0
    w_first = jnp.zeros((din_raw, FP), jnp.float32).at[:, :dout0].set(w0_folded)

    biases = jnp.zeros((L, FP), jnp.float32).at[0, :dout0].set(b0_folded)

    w_hidden_list, w_xyz_list = [], []
    for l in range(1, L):
        w = jnp.asarray(params[l][0], jnp.float32)
        b = jnp.asarray(params[l][1], jnp.float32)
        _, dout_l = layer_dims[l]
        prev_units = layer_dims[l - 1][1]
        wa = jnp.zeros((FP, FP), jnp.float32).at[:prev_units, :dout_l].set(
            w[:prev_units, :])
        w_hidden_list.append(wa)
        if use_xyz:
            wb = jnp.zeros((din_raw, FP), jnp.float32).at[
                nvs:nvs + 3, :dout_l].set(w[prev_units:prev_units + 3, :])
            w_xyz_list.append(wb)
        biases = biases.at[l, :dout_l].set(b)

    # MXU-native precision for weights; biases stay f32 (added post-accumulate).
    w_first = w_first.astype(compute_dtype)
    w_hidden = (jnp.stack(w_hidden_list).astype(compute_dtype)
                if w_hidden_list else None)
    w_xyz = (jnp.stack(w_xyz_list).astype(compute_dtype)
             if w_xyz_list else None)
    return w_first, w_hidden, w_xyz, biases


# ------------------------------- fused kernel ------------------------------- #

def _make_fused_kernel(num_layers, has_hidden, has_xyz, num_outputs,
                       compute_dtype):
    def kernel(*refs):
        it = iter(refs)
        x_ref = next(it)
        wf_ref = next(it)
        wh_ref = next(it) if has_hidden else None
        wx_ref = next(it) if has_xyz else None
        b_ref = next(it)
        o_ref = next(it)

        x = x_ref[...]                       # (TB, din_raw) raw f32 input
        x_c = x.astype(compute_dtype)        # bf16 operand for MXU
        b_all = b_ref[...]                   # (L, FP) f32, loaded once (hoisted)

        # Layer 0: normalization folded into wf / bias.
        z = jnp.dot(x_c, wf_ref[...], preferred_element_type=jnp.float32)
        z = z + b_all[0:1, :]
        for l in range(1, num_layers):
            h = jnp.maximum(z, 0.0).astype(compute_dtype)  # ReLU on layer l-1
            # TODO(synk): nn.Dropout is identity (eval mode); training dropout
            # not implemented.
            z = jnp.dot(h, wh_ref[l - 1], preferred_element_type=jnp.float32)
            if has_xyz:
                # xyz passthrough folded in as x_raw @ W_B_l (xyz rows only).
                z = z + jnp.dot(x_c, wx_ref[l - 1],
                                preferred_element_type=jnp.float32)
            z = z + b_all[l:l + 1, :]
        # Narrow, lane-masked store: only num_outputs columns go back to HBM.
        o_ref[...] = z[:, :num_outputs].astype(o_ref.dtype)

    return kernel


def mlp_stateless_forward(x, params, input_mean, input_std, config,
                          normalize_input=True, batch_tile=2048,
                          compute_dtype=jnp.bfloat16):
    """JAX/Pallas equivalent of MLPStateless.forward (eval mode), fully fused."""
    model_config = config['model']['config']
    use_xyz = model_config['use_xyz_passthrough_every_layer']
    num_outputs = model_config['num_outputs']
    L = len(params)

    w_first, w_hidden, w_xyz, biases = prepare_fused_params(
        params, input_mean, input_std, config, normalize_input, compute_dtype)

    B, din = x.shape
    FP = _FEAT_PAD
    has_hidden = L > 1
    has_xyz = use_xyz and has_hidden

    # Batch tile: big enough to amortize per-step pipeline overhead (~0.35 us),
    # but (when B allows) small enough that the "parallel" batch axis has at
    # least 2 grid steps -> both TensorCores busy on v7x.
    if B <= 8:
        TB = B
    else:
        TB = min(batch_tile, _round_up(pl.cdiv(B, 2), 8))
        TB = max(TB, 8)
    grid = (pl.cdiv(B, TB),)

    in_specs = [
        pl.BlockSpec((TB, din), lambda i: (i, 0)),
        # Constant-index weight specs: DMA'd once per core, stay resident in VMEM.
        pl.BlockSpec((din, FP), lambda i: (0, 0)),
    ]
    args = [x, w_first]
    if has_hidden:
        in_specs.append(pl.BlockSpec((L - 1, FP, FP), lambda i: (0, 0, 0)))
        args.append(w_hidden)
    if has_xyz:
        in_specs.append(pl.BlockSpec((L - 1, din, FP), lambda i: (0, 0, 0)))
        args.append(w_xyz)
    in_specs.append(pl.BlockSpec((L, FP), lambda i: (0, 0)))
    args.append(biases)

    out = pl.pallas_call(
        _make_fused_kernel(L, has_hidden, has_xyz, num_outputs, compute_dtype),
        out_shape=jax.ShapeDtypeStruct((B, num_outputs), x.dtype),
        grid=grid,
        in_specs=in_specs,
        # Narrow output block (last dim == full array dim num_outputs): avoids
        # writing a 128-lane padded slab and an external slice op.
        out_specs=pl.BlockSpec((TB, num_outputs), lambda i: (i, 0)),
        compiler_params=pltpu.CompilerParams(
            dimension_semantics=("parallel",)),
    )(*args)

    return out


# --------------------------- pure-JAX reference ----------------------------- #

def reference_forward(x, params, input_mean, input_std, config,
                      normalize_input=True):
    model_config = config['model']['config']
    use_xyz = model_config['use_xyz_passthrough_every_layer']
    _, nvs = build_layer_dims(config)
    eps = 0.001
    if use_xyz:
        xyz = x[:, nvs:nvs + 3] * 1.0
    if normalize_input:
        tail = x[:, nvs:] - input_mean
        if config['divide_by_std']:
            tail = tail / (input_std + eps)
        x = jnp.concatenate([x[:, :nvs], tail], axis=1)
    L = len(params)
    for i in range(L - 1):
        w, b = params[i]
        x = jax.nn.relu(x @ w + b)
        if use_xyz:
            x = jnp.concatenate([x, xyz], axis=1)
    w, b = params[-1]
    return x @ w + b


# ---------------------------------- Main ------------------------------------ #

if __name__ == "__main__":
    config = {
        'use_vision': True,
        'use_hard_3D_unprojection': False,
        'use_soft_3D_unprojection': False,
        'divide_by_std': True,
        'model': {
            'config': {
                'dropout_prob': 0.1,
                'num_ref_descriptors': 4,        # -> non_vision_index_start = 8
                'num_inputs': 16,                # total input dim = 16 + 8 = 24
                'num_outputs': 8,
                'units_per_layer': [32, 32, 32],
                'use_xyz_passthrough_every_layer': True,
            }
        },
    }

    layer_dims, non_vision_start = build_layer_dims(config)
    # layer_dims == [(24, 32), (35, 32), (35, 8)]

    key = jax.random.PRNGKey(0)
    batch = 8
    total_in = config['model']['config']['num_inputs'] + non_vision_start  # 24
    norm_dim = total_in - non_vision_start                                 # 16

    # Deterministic parameter init (synthetic; mimics torch Linear fan-in scale).
    params = []
    keys = jax.random.split(key, 2 * len(layer_dims) + 3)
    for li, (din, dout) in enumerate(layer_dims):
        bound = 1.0 / jnp.sqrt(din)
        w = jax.random.uniform(keys[2 * li], (din, dout),
                               minval=-bound, maxval=bound, dtype=jnp.float32)
        b = jax.random.uniform(keys[2 * li + 1], (dout,),
                               minval=-bound, maxval=bound, dtype=jnp.float32)
        params.append((w, b))

    input_mean = jax.random.normal(keys[-3], (norm_dim,), dtype=jnp.float32)
    input_std = jnp.abs(jax.random.normal(keys[-2], (norm_dim,),
                                          dtype=jnp.float32)) + 0.5
    x = jax.random.normal(keys[-1], (batch, total_in), dtype=jnp.float32)

    out = mlp_stateless_forward(x, params, input_mean, input_std, config)
    out = jax.block_until_ready(out)
    assert out.shape == (batch, config['model']['config']['num_outputs'])

    ref = jax.block_until_ready(
        reference_forward(x, params, input_mean, input_std, config))
    # Kernel uses bf16 weights / matmul operands (f32 accumulation); the f32
    # reference will differ at ~bf16 precision, so tolerance is loosened.
    max_err = float(jnp.max(jnp.abs(out - ref)))
    assert jnp.allclose(out, ref, rtol=5e-2, atol=5e-2), max_err

    print("KERNEL_OK")
</pallas_src>

<mosaic_0001>
module attributes {stable_mosaic.version = 11 : i64} {
  func.func @kernel(%arg0: i32, %arg1: memref<8x24xf32, #tpu.memory_space<vmem>>, %arg2: memref<24x128xbf16, #tpu.memory_space<vmem>>, %arg3: memref<2x128x128xbf16, #tpu.memory_space<vmem>>, %arg4: memref<2x24x128xbf16, #tpu.memory_space<vmem>>, %arg5: memref<3x128xf32, #tpu.memory_space<vmem>>, %arg6: memref<8x8xf32, #tpu.memory_space<vmem>>) attributes {dimension_semantics = [#tpu.dimension_semantics<parallel>], iteration_bounds = array<i64: 1>, scalar_prefetch = 0 : i64, scratch_operands = 0 : i64, tpu.core_type = #tpu.core_type<tc>, window_params = [{transform_indices = @transform_0, window_bounds = array<i64: 8, 24>}, {pipeline_mode = #tpu.pipeline_mode<synchronous>, transform_indices = @transform_1, window_bounds = array<i64: 24, 128>}, {pipeline_mode = #tpu.pipeline_mode<synchronous>, transform_indices = @transform_2, window_bounds = array<i64: 2, 128, 128>}, {pipeline_mode = #tpu.pipeline_mode<synchronous>, transform_indices = @transform_3, window_bounds = array<i64: 2, 24, 128>}, {pipeline_mode = #tpu.pipeline_mode<synchronous>, transform_indices = @transform_4, window_bounds = array<i64: 3, 128>}, {transform_indices = @transform_5, window_bounds = array<i64: 8, 8>}]} {
    %c0 = arith.constant 0 : index
    %c0_0 = arith.constant 0 : index
    %0 = vector.load %arg1[%c0, %c0_0] : memref<8x24xf32, #tpu.memory_space<vmem>>, vector<8x24xf32>
    %1 = arith.truncf %0 : vector<8x24xf32> to vector<8x24xbf16>
    %c0_1 = arith.constant 0 : index
    %c0_2 = arith.constant 0 : index
    %2 = vector.load %arg5[%c0_1, %c0_2] : memref<3x128xf32, #tpu.memory_space<vmem>>, vector<3x128xf32>
    %c0_3 = arith.constant 0 : index
    %c0_4 = arith.constant 0 : index
    %3 = vector.load %arg2[%c0_3, %c0_4] : memref<24x128xbf16, #tpu.memory_space<vmem>>, vector<24x128xbf16>
    %cst = arith.constant dense<0.000000e+00> : vector<8x128xf32>
    %4 = tpu.matmul %1, %3, %cst {dimension_numbers = #tpu.dot_dimension_numbers<[1], [0], [0], [1], [0, 0, 1, 1], [], []>} : vector<8x24xbf16>, vector<24x128xbf16>, vector<8x128xf32> -> vector<8x128xf32>
    %5 = vector.extract_strided_slice %2 {offsets = [0, 0], sizes = [1, 128], strides = [1, 1]} : vector<3x128xf32> to vector<1x128xf32>
    %6 = vector.broadcast %5 : vector<1x128xf32> to vector<8x128xf32>
    %7 = arith.addf %4, %6 : vector<8x128xf32>
    %cst_5 = arith.constant 0.000000e+00 : f32
    %8 = vector.broadcast %cst_5 : f32 to vector<8x128xf32>
    %9 = arith.maximumf %7, %8 : vector<8x128xf32>
    %10 = arith.truncf %9 : vector<8x128xf32> to vector<8x128xbf16>
    %c0_6 = arith.constant 0 : index
    %c0_7 = arith.constant 0 : index
    %c0_8 = arith.constant 0 : index
    %11 = vector.load %arg3[%c0_6, %c0_7, %c0_8] : memref<2x128x128xbf16, #tpu.memory_space<vmem>>, vector<1x128x128xbf16>
    %12 = vector.shape_cast %11 : vector<1x128x128xbf16> to vector<128x128xbf16>
    %cst_9 = arith.constant dense<0.000000e+00> : vector<8x128xf32>
    %13 = tpu.matmul %10, %12, %cst_9 {dimension_numbers = #tpu.dot_dimension_numbers<[1], [0], [0], [1], [0, 0, 1, 1], [], []>} : vector<8x128xbf16>, vector<128x128xbf16>, vector<8x128xf32> -> vector<8x128xf32>
    %c0_10 = arith.constant 0 : index
    %c0_11 = arith.constant 0 : index
    %c0_12 = arith.constant 0 : index
    %14 = vector.load %arg4[%c0_10, %c0_11, %c0_12] : memref<2x24x128xbf16, #tpu.memory_space<vmem>>, vector<1x24x128xbf16>
    %15 = vector.shape_cast %14 : vector<1x24x128xbf16> to vector<24x128xbf16>
    %cst_13 = arith.constant dense<0.000000e+00> : vector<8x128xf32>
    %16 = tpu.matmul %1, %15, %cst_13 {dimension_numbers = #tpu.dot_dimension_numbers<[1], [0], [0], [1], [0, 0, 1, 1], [], []>} : vector<8x24xbf16>, vector<24x128xbf16>, vector<8x128xf32> -> vector<8x128xf32>
    %17 = arith.addf %13, %16 : vector<8x128xf32>
    %18 = vector.extract_strided_slice %2 {offsets = [1, 0], sizes = [1, 128], strides = [1, 1]} : vector<3x128xf32> to vector<1x128xf32>
    %19 = vector.broadcast %18 : vector<1x128xf32> to vector<8x128xf32>
    %20 = arith.addf %17, %19 : vector<8x128xf32>
    %cst_14 = arith.constant 0.000000e+00 : f32
    %21 = vector.broadcast %cst_14 : f32 to vector<8x128xf32>
    %22 = arith.maximumf %20, %21 : vector<8x128xf32>
    %23 = arith.truncf %22 : vector<8x128xf32> to vector<8x128xbf16>
    %c1 = arith.constant 1 : index
    %c0_15 = arith.constant 0 : index
    %c0_16 = arith.constant 0 : index
    %24 = vector.load %arg3[%c1, %c0_15, %c0_16] : memref<2x128x128xbf16, #tpu.memory_space<vmem>>, vector<1x128x128xbf16>
    %25 = vector.shape_cast %24 : vector<1x128x128xbf16> to vector<128x128xbf16>
    %cst_17 = arith.constant dense<0.000000e+00> : vector<8x128xf32>
    %26 = tpu.matmul %23, %25, %cst_17 {dimension_numbers = #tpu.dot_dimension_numbers<[1], [0], [0], [1], [0, 0, 1, 1], [], []>} : vector<8x128xbf16>, vector<128x128xbf16>, vector<8x128xf32> -> vector<8x128xf32>
    %c1_18 = arith.constant 1 : index
    %c0_19 = arith.constant 0 : index
    %c0_20 = arith.constant 0 : index
    %27 = vector.load %arg4[%c1_18, %c0_19, %c0_20] : memref<2x24x128xbf16, #tpu.memory_space<vmem>>, vector<1x24x128xbf16>
    %28 = vector.shape_cast %27 : vector<1x24x128xbf16> to vector<24x128xbf16>
    %cst_21 = arith.constant dense<0.000000e+00> : vector<8x128xf32>
    %29 = tpu.matmul %1, %28, %cst_21 {dimension_numbers = #tpu.dot_dimension_numbers<[1], [0], [0], [1], [0, 0, 1, 1], [], []>} : vector<8x24xbf16>, vector<24x128xbf16>, vector<8x128xf32> -> vector<8x128xf32>
    %30 = arith.addf %26, %29 : vector<8x128xf32>
    %31 = vector.extract_strided_slice %2 {offsets = [2, 0], sizes = [1, 128], strides = [1, 1]} : vector<3x128xf32> to vector<1x128xf32>
    %32 = vector.broadcast %31 : vector<1x128xf32> to vector<8x128xf32>
    %33 = arith.addf %30, %32 : vector<8x128xf32>
    %34 = vector.extract_strided_slice %33 {offsets = [0, 0], sizes = [8, 8], strides = [1, 1]} : vector<8x128xf32> to vector<8x8xf32>
    %c0_22 = arith.constant 0 : index
    %c0_23 = arith.constant 0 : index
    %35 = vector.load %arg6[%c0_22, %c0_23] : memref<8x8xf32, #tpu.memory_space<vmem>>, vector<8x8xf32>
    tpu.vector_store %arg6[%c0_22, %c0_23], %34 {strides = array<i32>} : memref<8x8xf32, #tpu.memory_space<vmem>>, vector<8x8xf32>,
    return
  }
  func.func @transform_0(%arg0: i32) -> (i32, i32) {
    %c0_i32 = arith.constant 0 : i32
    %c0_i32_0 = arith.constant 0 : i32
    return %arg0, %c0_i32 : i32, i32
  }
  func.func @transform_1(%arg0: i32) -> (i32, i32) {
    %c0_i32 = arith.constant 0 : i32
    %c0_i32_0 = arith.constant 0 : i32
    %c0_i32_1 = arith.constant 0 : i32
    return %c0_i32, %c0_i32_0 : i32, i32
  }
  func.func @transform_2(%arg0: i32) -> (i32, i32, i32) {
    %c0_i32 = arith.constant 0 : i32
    %c0_i32_0 = arith.constant 0 : i32
    %c0_i32_1 = arith.constant 0 : i32
    %c0_i32_2 = arith.constant 0 : i32
    return %c0_i32, %c0_i32_0, %c0_i32_1 : i32, i32, i32
  }
  func.func @transform_3(%arg0: i32) -> (i32, i32, i32) {
    %c0_i32 = arith.constant 0 : i32
    %c0_i32_0 = arith.constant 0 : i32
    %c0_i32_1 = arith.constant 0 : i32
    %c0_i32_2 = arith.constant 0 : i32
    return %c0_i32, %c0_i32_0, %c0_i32_1 : i32, i32, i32
  }
  func.func @transform_4(%arg0: i32) -> (i32, i32) {
    %c0_i32 = arith.constant 0 : i32
    %c0_i32_0 = arith.constant 0 : i32
    %c0_i32_1 = arith.constant 0 : i32
    return %c0_i32, %c0_i32_0 : i32, i32
  }
  func.func @transform_5(%arg0: i32) -> (i32, i32) {
    %c0_i32 = arith.constant 0 : i32
    %c0_i32_0 = arith.constant 0 : i32
    return %arg0, %c0_i32 : i32, i32
  }
}

</mosaic_0001>

<bundles_post_ra>
// kernel: tpu_custom_call.1
= control target key start
LH: loop header
LB: loop body
LE: loop exit
PB: predicated region body
PF: predicated region fallthrough
CT: control target
= control target key end

     0   :  { %10 = vsyncpa [#allocation3], 0  ;;  %s909_s0 = inlined_call_operand.hbm [shape: f32[8,24], index: 0, kind: input, shape index: {}]   ;;  %s910_s1 = inlined_call_operand.hbm [shape: bf16[24,128], index: 1, kind: input, shape index: {}]   ;;  %s911_s2 = inlined_call_operand.hbm [shape: bf16[2,128,128], index: 2, kind: input, shape index: {}]   ;;  %s912_s3 = inlined_call_operand.hbm [shape: bf16[2,24,128], index: 3, kind: input, shape index: {}]   ;;  %s913_s4 = inlined_call_operand.vmem [shape: f32[3,128], index: 4, kind: input, shape index: {}]   ;;  %s914_s5 = inlined_call_operand.hbm [shape: f32[8,8], index: 5, kind: output, shape index: {}]  }
   0x1   :  { %11 = vsyncpa [#allocation6], 0 }
   0x2   :  { %12 = vsyncpa [#allocation9], 0 }
   0x3   :  { %13 = vsyncpa [#allocation4], 0  ;;  %s760_s18 = smov [#allocation5]   ;;  %s642_s22 = scalar_lea.hbm %s910_s1, 192 }
   0x4   :  { %s29_s19 = sshll.u32 %s760_s18, 4  ;;  %p643_p0 = scmp.ne.s32.totalorder %s910_s1, %s642_s22  ;;  %s30_s19 = int_to_ptr.vmem [resolvable:$true] %s29_s19 }
   0x5   :  { %p646_p1 = scmp.lt.u32.totalorder %s642_s22, %s910_s1 }
   0x7   :  { %p648_p2 = pnand %p646_p1, %p643_p0 }
   0x9   :  { %651 = shalt.err (!%p648_p2)
}
   0xa   :  { %s652_s27 = scalar_lea.vmem %s30_s19, 192  ;;  %p657_p4 = scmp.lt.s32.totalorder %s30_s19, %s30_s19 }
   0xb   :  { %p653_p3 = scmp.ne.s32.totalorder %s30_s19, %s652_s27  ;;  %p658_p5 = scmp.lt.s32.totalorder %s652_s27, %s652_s27 }
   0xd   :  { %p659_p6 = por %p658_p5, %p657_p4 }
   0xf   :  { %p660_p7 = pnand %p659_p6, %p653_p3 }
  0x11   :  { %663 = shalt.err (!%p660_p7)
}
  0x12   :  { %s761_s28 = smov 64   ;;  %s762_s29 = smov 4  }
  0x13   :  { %35 = dma.hbm_to_vmem [thread:$0]  %s910_s1, 192, %s30_s19, [#allocation6], %s761_s28, %s761_s28, %s762_s29  }
  0x14   :  { %s763_s7 = smov [#allocation2]   ;;  %s764_s9 = smov [#allocation7]  }
  0x15   :  { %s20_s8 = sshll.u32 %s763_s7, 4  ;;  %s41_s10 = sshll.u32 %s764_s9, 4  ;;  %s21_s8 = int_to_ptr.vmem [resolvable:$true] %s20_s8  ;;  %s42_s10 = int_to_ptr.vmem [resolvable:$true] %s41_s10 }
  0x16   :  { %s664_s13 = scalar_lea.hbm %s909_s0, 128 }
  0x17   :  { %p665_p8 = scmp.ne.s32.totalorder %s909_s0, %s664_s13  ;;  %p668_p9 = scmp.lt.u32.totalorder %s664_s13, %s909_s0 }
  0x19   :  { %p670_p10 = pnand %p668_p9, %p665_p8 }
  0x1b   :  { %673 = shalt.err (!%p670_p10)
}
  0x1c   :  { %s674_s1 = scalar_lea.vmem %s21_s8, 128  ;;  %p679_p12 = scmp.lt.s32.totalorder %s21_s8, %s21_s8 }
  0x1d   :  { %p675_p11 = scmp.ne.s32.totalorder %s21_s8, %s674_s1  ;;  %p680_p13 = scmp.lt.s32.totalorder %s674_s1, %s674_s1 }
  0x1f   :  { %p681_p0 = por %p680_p13, %p679_p12 }
  0x21   :  { %p682_p1 = pnand %p681_p0, %p675_p11 }
  0x23   :  { %685 = shalt.err (!%p682_p1)
}
  0x24   :  { %23 = dma.hbm_to_vmem [thread:$0]  %s909_s0, 128, %s21_s8, [#allocation3]  }
  0x25   :  { %s686_s22 = scalar_lea.hbm %s911_s2, 2048 }
  0x26   :  { %p687_p2 = scmp.ne.s32.totalorder %s911_s2, %s686_s22  ;;  %p690_p3 = scmp.lt.u32.totalorder %s686_s22, %s911_s2 }
  0x28   :  { %p692_p4 = pnand %p690_p3, %p687_p2 }
  0x2a   :  { %695 = shalt.err (!%p692_p4)
}
  0x2b   :  { %s696_s27 = scalar_lea.vmem %s42_s10, 2048  ;;  %p701_p6 = scmp.lt.s32.totalorder %s42_s10, %s42_s10 }
  0x2c   :  { %p697_p5 = scmp.ne.s32.totalorder %s42_s10, %s696_s27  ;;  %p702_p7 = scmp.lt.s32.totalorder %s696_s27, %s696_s27 }
  0x2e   :  { %p703_p8 = por %p702_p7, %p701_p6 }
  0x30   :  { %p704_p9 = pnand %p703_p8, %p697_p5 }
  0x32   :  { %707 = shalt.err (!%p704_p9)
}
  0x33   :  { %47 = dma.hbm_to_vmem [thread:$0]  %s911_s2, 2048, %s42_s10, [#allocation6], %s761_s28, %s761_s28, %s762_s29  }
  0x34   :  { %s765_s6 = smov [#allocation8]   ;;  %s708_s11 = scalar_lea.hbm %s912_s3, 384 }
  0x35   :  { %s53_s7 = sshll.u32 %s765_s6, 4  ;;  %p709_p10 = scmp.ne.s32.totalorder %s912_s3, %s708_s11  ;;  %s54_s7 = int_to_ptr.vmem [resolvable:$true] %s53_s7 }
  0x36   :  { %p712_p11 = scmp.lt.u32.totalorder %s708_s11, %s912_s3 }
  0x38   :  { %p714_p12 = pnand %p712_p11, %p709_p10 }
  0x3a   :  { %717 = shalt.err (!%p714_p12)
}
  0x3b   :  { %s718_s16 = scalar_lea.vmem %s54_s7, 384  ;;  %p723_p0 = scmp.lt.s32.totalorder %s54_s7, %s54_s7 }
  0x3c   :  { %p719_p13 = scmp.ne.s32.totalorder %s54_s7, %s718_s16  ;;  %p724_p1 = scmp.lt.s32.totalorder %s718_s16, %s718_s16 }
  0x3e   :  { %p725_p2 = por %p724_p1, %p723_p0 }
  0x40   :  { %p726_p3 = pnand %p725_p2, %p719_p13 }
  0x42   :  { %729 = shalt.err (!%p726_p3)
}
  0x43   :  { %59 = dma.hbm_to_vmem [thread:$0]  %s912_s3, 384, %s54_s7, [#allocation9], %s761_s28, %s761_s28, %s762_s29  }
  0x44   :  { %752 = dma.done.wait [#allocation3], 128  }
  0x45   :  { %753 = vsyncadd [#allocation3], 4294967168 }
  0x46   :  { %754 = dma.done.wait [#allocation6], 2240  }
  0x47   :  { %755 = vsyncadd [#allocation6], 4294965056 }
  0x48   :  { %756 = dma.done.wait [#allocation9], 384  }
  0x49   :  { %757 = vsyncadd [#allocation9], 4294966912  ;;  %v766_v0 = vmov 0.0   ;;  %vm767_vm0 = vmmov 0   ;;  %v620_v1 = vld [vmem:[#allocation5] sm:$0xff]   ;;  %vm98_vm1 = vcmask 1043456   ;;  %v81_v26 = vlaneseq }
  0x4a   :  { %547 = vmatprep.subr.bf16.mxu0 %v766_v0  ;;  %551 = vmatprep.mubr.msk.bf16.mxu0 %vm767_vm0, %v766_v0  ;;  %v621_v2 = vld [vmem:[#allocation5 + $0x8] ss:$0 sps:$4 sm:$0xff]   ;;  %v75_v3 = vld [vmem:[#allocation2] sm:$0xff]  ;;  %vm94_vm2 = vcmask 195584   ;;  %v622_v6 = vld [vmem:[#allocation7] sm:$0xff]   ;;  %vm476_vm3 = vcmask 64512  }
  0x4b   :  { %555 = vmatprep.subr.bf16.mxu1 %v766_v0  ;;  %559 = vmatprep.mubr.msk.bf16.mxu1 %vm767_vm0, %v766_v0  ;;  %v100_v4 = vsel %vm98_vm1, %v621_v2, 0  ;;  %v76_v5 = vpack.c.bf16 %v75_v3, %v75_v3  ;;  %v628_v7 = vld [vmem:[#allocation8] sm:$0xff]   ;;  %v623_v8 = vld [vmem:[#allocation7 + $0x8] sm:$0xff]   ;;  %v624_v9 = vld [vmem:[#allocation7 + $0x10] sm:$0xff]   ;;  %v82_v27 = vshrl.u32 %v81_v26, 7 }
  0x4c   :  { %548 = vmatpush3.bf16.msra.mxu0 %v620_v1  ;;  %556 = vmatpush3.bf16.msra.mxu1 %v628_v7  ;;  %v625_v10 = vld [vmem:[#allocation7 + $0x18] sm:$0xff]   ;;  %v626_v11 = vld [vmem:[#allocation7 + $0x20] sm:$0xff]   ;;  %v627_v12 = vld [vmem:[#allocation7 + $0x28] sm:$0xff]  }
  0x4d   :  { %549 = vmatprep.subr.bf16.mxu0 %v766_v0  ;;  %557 = vmatprep.subr.bf16.mxu1 %v766_v0  ;;  %v629_v13 = vld [vmem:[#allocation7 + $0x30] sm:$0xff]   ;;  %v630_v14 = vld [vmem:[#allocation8 + $0x8] ss:$0 sps:$4 sm:$0xff]   ;;  %v631_v16 = vld [vmem:[#allocation7 + $0x38] sm:$0xff]   ;;  %v83_v28 = vsub.s32 0, %v82_v27  ;;  %v305_v48 = vsub.s32 1, %v82_v27 }
  0x4e   :  { %v173_v15 = vsel %vm98_vm1, %v630_v14, 0  ;;  %v632_v17 = vld [vmem:[#allocation8 + $0xc] sm:$0xff]   ;;  %v633_v18 = vld [vmem:[#allocation8 + $0x14] ss:$0 sps:$4 sm:$0xff]   ;;  %v634_v20 = vld [vmem:[#allocation7 + $0x40] sm:$0xff]   ;;  %v473_v58 = vsub.s32 2, %v82_v27 }
  0x4f   :  { %v341_v19 = vsel %vm98_vm1, %v633_v18, 0  ;;  %v635_v21 = vld [vmem:[#allocation7 + $0x48] sm:$0xff]   ;;  %v636_v22 = vld [vmem:[#allocation7 + $0x50] sm:$0xff]   ;;  %v637_v23 = vld [vmem:[#allocation7 + $0x58] sm:$0xff]  }
  0x50   :  { %550 = vmatpush3.bf16.msra.mxu0 %v100_v4  ;;  %558 = vmatpush3.bf16.msra.mxu1 %v173_v15  ;;  %v638_v24 = vld [vmem:[#allocation7 + $0x60] sm:$0xff]   ;;  %v639_v25 = vld [vmem:[#allocation7 + $0x68] sm:$0xff]   ;;  %v640_v42 = vld [vmem:[#allocation7 + $0x70] sm:$0xff]  }
  0x51   :  { %563 = vmatprep.subr.bf16.mxu0 %v766_v0  ;;  %583 = vmatprep.subr.bf16.mxu1 %v766_v0  ;;  %v77_v29 = vld [vmem:[%s913_s4] sm:$0x7]  ;;  %v641_v43 = vld [vmem:[#allocation7 + $0x78] sm:$0xff]   ;;  %s768_s4 = smov [#allocation10]  }
  0x52   :  { %v84_v30 = vrot.slane %v77_v29, %v83_v28  ;;  %v306_v49 = vrot.slane %v77_v29, %v305_v48  ;;  %v474_v59 = vrot.slane %v77_v29, %v473_v58  ;;  %s484_s29 = sshll.u32 %s768_s4, 4  ;;  %s485_s29 = int_to_ptr.vmem [resolvable:$true] %s484_s29 }
  0x53   :  { %552 = vmatmul.mubr.msk.bf16.vlgmr.msra.gmra.mrb[0].mxu0 %vm94_vm2, %v76_v5  ;;  %560 = vmatmul.mubr.msk.bf16.vlgmr.msra.gmra.mrb[0].mxu1 %vm94_vm2, %v76_v5  ;;  %s730_s17 = scalar_lea.vmem %s485_s29, 128  ;;  %p735_p5 = scmp.lt.s32.totalorder %s485_s29, %s485_s29 }
  0x54   :  { %564 = vmatpush3.bf16.msra.mxu0 %v622_v6  ;;  %579 = vmatprep.mubr.msk.bf16.mxu0 %vm767_vm0, %v766_v0  ;;  %p731_p4 = scmp.ne.s32.totalorder %s485_s29, %s730_s17  ;;  %p736_p6 = scmp.lt.s32.totalorder %s730_s17, %s730_s17 }
  0x55   :  { %565 = vmatprep.subr.bf16.mxu0 %v766_v0  ;;  %587 = vmatprep.mubr.msk.bf16.mxu1 %vm767_vm0, %v766_v0 }
  0x56   :  { %584 = vmatpush3.bf16.msra.mxu1 %v632_v17  ;;  %p737_p7 = por %p736_p6, %p735_p5 }
  0x57   :  { %585 = vmatprep.subr.bf16.mxu1 %v766_v0 }
  0x58   :  { %566 = vmatpush3.bf16.msra.mxu0 %v623_v8  ;;  %p738_p8 = pnand %p737_p7, %p731_p4 }
  0x59   :  { %567 = vmatprep.subr.bf16.mxu0 %v766_v0 }
  0x5a   :  { %586 = vmatpush3.bf16.msra.mxu1 %v341_v19 }
  0x5b   :  { %591 = vmatprep.subr.bf16.mxu1 %v766_v0 }
  0x5c   :  { %568 = vmatpush3.bf16.msra.mxu0 %v624_v9 }
  0x5d   :  { %569 = vmatprep.subr.bf16.mxu0 %v766_v0  ;;  %588 = vmatmul.mubr.msk.bf16.vlgmr.msra.gmra.mrb[4].mxu1 %vm94_vm2, %v76_v5 }
  0x5e   :  { %592 = vmatpush3.bf16.msra.mxu1 %v634_v20  ;;  %607 = vmatprep.mubr.msk.bf16.mxu1 %vm767_vm0, %v766_v0 }
  0x5f   :  { %593 = vmatprep.subr.bf16.mxu1 %v766_v0 }
  0x60   :  { %570 = vmatpush3.bf16.msra.mxu0 %v625_v10 }
  0x61   :  { %571 = vmatprep.subr.bf16.mxu0 %v766_v0 }
  0x62   :  { %594 = vmatpush3.bf16.msra.mxu1 %v635_v21 }
  0x63   :  { %595 = vmatprep.subr.bf16.mxu1 %v766_v0 }
  0x64   :  { %572 = vmatpush3.bf16.msra.mxu0 %v626_v11 }
  0x65   :  { %573 = vmatprep.subr.bf16.mxu0 %v766_v0 }
  0x66   :  { %596 = vmatpush3.bf16.msra.mxu1 %v636_v22 }
  0x67   :  { %597 = vmatprep.subr.bf16.mxu1 %v766_v0 }
  0x68   :  { %574 = vmatpush3.bf16.msra.mxu0 %v627_v12 }
  0x69   :  { %575 = vmatprep.subr.bf16.mxu0 %v766_v0 }
  0x6a   :  { %598 = vmatpush3.bf16.msra.mxu1 %v637_v23 }
  0x6b   :  { %599 = vmatprep.subr.bf16.mxu1 %v766_v0 }
  0x6c   :  { %576 = vmatpush3.bf16.msra.mxu0 %v629_v13 }
  0x6d   :  { %577 = vmatprep.subr.bf16.mxu0 %v766_v0 }
  0x6e   :  { %600 = vmatpush3.bf16.msra.mxu1 %v638_v24 }
  0x6f   :  { %601 = vmatprep.subr.bf16.mxu1 %v766_v0 }
  0x70   :  { %578 = vmatpush3.bf16.msra.mxu0 %v631_v16 }
  0x72   :  { %602 = vmatpush3.bf16.msra.mxu1 %v639_v25 }
  0x73   :  { %603 = vmatprep.subr.bf16.mxu1 %v766_v0 }
  0x76   :  { %604 = vmatpush3.bf16.msra.mxu1 %v640_v42 }
  0x77   :  { %605 = vmatprep.subr.bf16.mxu1 %v766_v0 }
  0x7a   :  { %606 = vmatpush3.bf16.msra.mxu1 %v641_v43 }
 0x126   :  { %v136_v31 = vpop.f32.mrb[0].mxu0  ;;  %v209_v38 = vpop.f32.mrb[0].mxu1 }
 0x127   :  { %v137_v32 = vadd.f32 %v136_v31, %v84_v30  ;;  %v553_v33 = vpop.f32.mrb[1].mxu0  ;;  %v561_v39 = vpop.f32.mrb[1].mxu1 }
 0x128   :  { %v139_v34 = vpop.f32.mrb[2].mxu0  ;;  %v212_v40 = vpop.f32.mrb[2].mxu1 }
 0x129   :  { %v142_v35 = vmax.f32 %v137_v32, 0.0  ;;  %v554_v36 = vpop.f32.mrb[3].mxu0  ;;  %v562_v41 = vpop.f32.mrb[3].mxu1 }
 0x12b   :  { %v143_v37 = vpack.c.bf16 %v142_v35, %v142_v35 }
 0x12d   :  { %580 = vmatmul.mubr.bf16.vlgmr.msra.gmra.mrb[4].mxu0 %v143_v37 }
 0x130   :  { %v377_v44 = vpop.f32.mrb[4].mxu1 }
 0x131   :  { %v589_v45 = vpop.f32.mrb[5].mxu1 }
 0x132   :  { %v380_v46 = vpop.f32.mrb[6].mxu1 }
 0x133   :  { %v590_v47 = vpop.f32.mrb[7].mxu1 }
 0x200   :  { %v297_v50 = vpop.f32.mrb[4].mxu0 }
 0x201   :  { %v298_v51 = vadd.f32 %v297_v50, %v209_v38  ;;  %v581_v52 = vpop.f32.mrb[5].mxu0 }
 0x202   :  { %v300_v53 = vpop.f32.mrb[6].mxu0 }
 0x203   :  { %v307_v54 = vadd.f32 %v306_v49, %v298_v51  ;;  %v582_v55 = vpop.f32.mrb[7].mxu0 }
 0x205   :  { %v308_v56 = vmax.f32 %v307_v54, 0.0 }
 0x207   :  { %v309_v57 = vpack.c.bf16 %v308_v56, %v308_v56 }
 0x209   :  { %608 = vmatmul.mubr.bf16.vlgmr.msra.gmra.mrb[8].mxu1 %v309_v57 }
 0x2dc   :  { %v465_v60 = vpop.f32.mrb[8].mxu1 }
 0x2dd   :  { %v466_v61 = vadd.f32 %v465_v60, %v377_v44  ;;  %v609_v62 = vpop.f32.mrb[9].mxu1 }
 0x2de   :  { %v468_v63 = vpop.f32.mrb[10].mxu1 }
 0x2df   :  { %v475_v0 = vadd.f32 %v474_v59, %v466_v61  ;;  %v610_v1 = vpop.f32.mrb[11].mxu1 }
 0x2e1   :  { %477 = vst.msk [vmem:[#allocation10] sm:$0xff] %vm476_vm3, %v475_v0 }
 0x2e2   :  { %741 = shalt.err (!%p738_p8)
}
 0x2e3   :  { %s742_s19 = scalar_lea.hbm %s914_s5, 128 }
 0x2e4   :  { %p743_p9 = scmp.ne.s32.totalorder %s914_s5, %s742_s19  ;;  %p746_p10 = scmp.lt.u32.totalorder %s742_s19, %s914_s5 }
 0x2e6   :  { %p748_p11 = pnand %p746_p10, %p743_p9 }
 0x2e8   :  { %751 = shalt.err (!%p748_p11)
}
 0x2e9   :  { %487 = dma.vmem_to_hbm [thread:$0]  %s485_s29, 128, %s914_s5, [#allocation4]  }
 0x2ea   :  { %758 = dma.done.wait [#allocation4], 128  }
 0x2eb   :  { %759 = vsyncadd [#allocation4], 4294967168 }
 0x2ec   :  { %491 = vsyncpa [#allocation3], 1 }
 0x2ed   :  { %492 = vsyncpa [#allocation6], 1 }
 0x2ee   :  { %493 = vsyncpa [#allocation9], 1 }
 0x2ef   :  { %494 = vsyncpa [#allocation4], 1 }

</bundles_post_ra>
